<compile_context>
chip_gen: v7x
topology: tpu7x:2x2x1
jax: 0.10.0
libtpu: 0.0.40
codegen_flags: <defaults>
</compile_context>

<pallas_src>
import functools

import jax
import jax.numpy as jnp
from jax.experimental import pallas as pl
from jax.experimental.pallas import tpu as pltpu

H = 32          # hidden_size
NH = 8          # num_heads  (PyTorch module hard-codes 8)
HD = H // NH    # head_dim = 4
EPS = 1e-5      # nn.LayerNorm default eps


def mha_ln_kernel(x_ref, wqkv_ref, bqkv_ref, gq_ref, ge_ref, wo_ref, bo_ref,
                  gamma_ref, beta_ref, o_ref):
    """One batch tile (TB, S, H) per grid step."""
    TB, S, Hd = x_ref.shape
    BS = TB * S
    x2 = x_ref[...].reshape(BS, Hd)                              # (BS, H)

    # --- fused QKV projection (softmax scale already folded into Q cols) ---
    qkv = jnp.dot(x2, wqkv_ref[...],
                  preferred_element_type=jnp.float32) + bqkv_ref[...]
    q = qkv[:, 0 * Hd:1 * Hd].reshape(TB, S, Hd)                 # heads in lanes
    k = qkv[:, 1 * Hd:2 * Hd].reshape(TB, S, Hd)
    v = qkv[:, 2 * Hd:3 * Hd].reshape(TB, S, Hd)

    # --- all-head scores: elementwise outer product over feature lanes, then
    #     constant 0/1 group-sum matmul (H -> NH). s[b,i,j,h] = q_h[b,i].k_h[b,j]
    prod = q[:, :, None, :] * k[:, None, :, :]                   # (TB,S,S,H)
    s = jnp.dot(prod.reshape(BS * S, Hd), gq_ref[...],
                preferred_element_type=jnp.float32).reshape(TB, S, S, NH)

    # --- softmax over keys (axis 2), numerically stable ---
    s = s - jnp.max(s, axis=2, keepdims=True)
    p = jnp.exp(s)
    p = p * pl.reciprocal(jnp.sum(p, axis=2, keepdims=True), approx=False)

    # --- expand probs back to the (head, dim) 32-lane layout and contract
    #     over keys: ctx[b,i,4h+d] = sum_j p[b,i,j,h] * v[b,j,4h+d] ---
    pe = jnp.dot(p.reshape(BS * S, NH), ge_ref[...],
                 preferred_element_type=jnp.float32).reshape(TB, S, S, Hd)
    ctx = jnp.sum(pe * v[:, None, :, :], axis=2)                 # (TB,S,H)

    # --- fused output projection + residual + out-proj bias (added once) ---
    y = x2 + bo_ref[...] + jnp.dot(ctx.reshape(BS, Hd), wo_ref[...],
                                   preferred_element_type=jnp.float32)

    # --- one-pass LayerNorm: var = E[y^2] - mean^2 ---
    mean = jnp.mean(y, axis=-1, keepdims=True)
    var = jnp.mean(y * y, axis=-1, keepdims=True) - mean * mean
    out = (y - mean) * jax.lax.rsqrt(var + EPS) * gamma_ref[...] + beta_ref[...]
    o_ref[...] = out.reshape(TB, S, Hd).astype(o_ref.dtype)


def _pick_tile_params(B, S, Hd):
    """Generation-aware batch tile + VMEM limit."""
    try:
        vmem_cap = pltpu.get_tpu_info().vmem_capacity_bytes
    except Exception:
        vmem_cap = 64 << 20
    if vmem_cap >= (128 << 20):          # v5e / v6e
        tile_target = 2 << 20            # ~2 MiB x-tile
        vmem_limit = 80 << 20
    else:                                # v7x (64 MiB physical per TC)
        tile_target = 1 << 20            # ~1 MiB x-tile
        vmem_limit = 32 << 20
    tb_cap = max(1, tile_target // (S * Hd * 4))
    # >= 4 grid steps when B allows: both v7x TCs busy AND double-buffered.
    tb = int(max(1, min(tb_cap, -(-B // 4))))
    return tb, vmem_limit


@functools.partial(jax.jit, static_argnames=("tb", "vmem_limit"))
def _cross_lingual_alignment(x, wqkv, bqkv, wo, bo, gamma, beta, *, tb, vmem_limit):
    B, S, Hd = x.shape
    assert Hd == H and H % NH == 0

    grid_b = pl.cdiv(B, tb)
    B_pad = grid_b * tb
    x_p = jnp.pad(x, ((0, B_pad - B), (0, 0), (0, 0))) if B_pad != B else x

    # --- fold softmax scale 1/sqrt(HD) into the Q third of the fused weight ---
    scale = 1.0 / (HD ** 0.5)
    wqkv_s = jnp.concatenate([wqkv[:, :H] * scale, wqkv[:, H:]], axis=1)  # (H,3H)
    bqkv_s = jnp.concatenate([bqkv[:, :H] * scale, bqkv[:, H:]], axis=1)  # (1,3H)

    # --- constant 0/1 head group-sum (H->NH) and expand (NH->H) matrices ---
    gq = (jnp.arange(H)[:, None] // HD ==
          jnp.arange(NH)[None, :]).astype(jnp.float32)                   # (H,NH)
    ge = gq.T                                                            # (NH,H)

    # --- advisory cost estimate for the XLA scheduler ---
    flops_per_b = (2 * S * H * 3 * H          # fused QKV
                   + S * S * H                # q*k outer product
                   + 2 * S * S * H * NH       # group-sum matmul
                   + 2 * S * S * NH * H       # prob expand matmul
                   + 2 * S * S * H            # prob * v + reduce
                   + 2 * S * H * H)           # fused out-proj
    param_bytes = 4 * (3 * H * H + H * H + 2 * H * NH + 5 * H)
    cost = pl.CostEstimate(
        flops=B_pad * flops_per_b,
        transcendentals=B_pad * NH * S * S,
        bytes_accessed=2 * B_pad * S * H * 4 + param_bytes,
    )

    wspec = lambda shape: pl.BlockSpec(shape, lambda b: (0, 0))

    out = pl.pallas_call(
        mha_ln_kernel,
        out_shape=jax.ShapeDtypeStruct((B_pad, S, Hd), x.dtype),
        grid=(grid_b,),
        in_specs=[
            pl.BlockSpec((tb, S, Hd), lambda b: (b, 0, 0)),   # x tile
            wspec((H, 3 * H)),                                # fused Wqkv
            wspec((1, 3 * H)),                                # fused bqkv
            wspec((H, NH)),                                   # group-sum matrix
            wspec((NH, H)),                                   # expand matrix
            wspec((H, H)),                                    # Wo
            wspec((1, H)),                                    # bo
            wspec((1, H)),                                    # ln gamma
            wspec((1, H)),                                    # ln beta
        ],
        out_specs=pl.BlockSpec((tb, S, Hd), lambda b: (b, 0, 0)),
        compiler_params=pltpu.CompilerParams(
            dimension_semantics=("parallel",),
            vmem_limit_bytes=vmem_limit),
        cost_estimate=cost,
    )(x_p, wqkv_s, bqkv_s, gq, ge, wo, bo, gamma, beta)

    return out[:B] if B_pad != B else out


def cross_lingual_alignment(x, wqkv, bqkv, wo, bo, gamma, beta):
    B, S, Hd = x.shape
    tb, vmem_limit = _pick_tile_params(B, S, Hd)
    return _cross_lingual_alignment(x, wqkv, bqkv, wo, bo, gamma, beta,
                                    tb=tb, vmem_limit=vmem_limit)


def reference(x, wqkv, bqkv, wo, bo, gamma, beta):
    """Pure-JAX reference mirroring nn.MultiheadAttention + LayerNorm."""
    B, S, _ = x.shape
    qkv = x @ wqkv + bqkv                                     # (B, S, 3H)
    q, k, v = jnp.split(qkv, 3, axis=-1)

    def split_heads(t):
        return t.reshape(B, S, NH, HD).transpose(0, 2, 1, 3)  # (B, NH, S, HD)

    qh, kh, vh = map(split_heads, (q, k, v))
    s = jnp.einsum('bhqd,bhkd->bhqk', qh, kh) / jnp.sqrt(HD)
    p = jax.nn.softmax(s, axis=-1)
    o = jnp.einsum('bhqk,bhkd->bhqd', p, vh)
    o = o.transpose(0, 2, 1, 3).reshape(B, S, H)
    aligned = o @ wo + bo
    y = x + aligned
    mean = y.mean(-1, keepdims=True)
    var = ((y - mean) ** 2).mean(-1, keepdims=True)
    return (y - mean) / jnp.sqrt(var + EPS) * gamma + beta


if __name__ == "__main__":
    S = 8
    key = jax.random.PRNGKey(0)
    kx, kw, kb, kwo, kbo, kg, kbt = jax.random.split(key, 7)

    # Deterministic synthetic parameters (shapes follow the PyTorch module;
    # stored in "x @ W" orientation — transposed vs. PyTorch checkpoints).
    wqkv = 0.05 * jax.random.normal(kw, (H, 3 * H), dtype=jnp.float32)   # in_proj
    bqkv = 0.05 * jax.random.normal(kb, (1, 3 * H), dtype=jnp.float32)
    wo = 0.05 * jax.random.normal(kwo, (H, H), dtype=jnp.float32)        # out_proj
    bo = 0.05 * jax.random.normal(kbo, (1, H), dtype=jnp.float32)
    gamma = 1.0 + 0.05 * jax.random.normal(kg, (1, H), dtype=jnp.float32)
    beta = 0.05 * jax.random.normal(kbt, (1, H), dtype=jnp.float32)

    for B in (2, 5):   # B=2: tb=1 even grid; B=5: exercises the padding path
        xk = jax.random.fold_in(kx, B)
        x = jax.random.normal(xk, (B, S, H), dtype=jnp.float32)

        out = cross_lingual_alignment(x, wqkv, bqkv, wo, bo, gamma, beta)
        out = jax.block_until_ready(out)

        ref = reference(x, wqkv, bqkv, wo, bo, gamma, beta)
        assert out.shape == (B, S, H)
        assert jnp.allclose(out, ref, atol=1e-4, rtol=1e-4), \
            f"B={B}: max abs diff {jnp.max(jnp.abs(out - ref))}"

    print("KERNEL_OK")
</pallas_src>

<mosaic_0001>
module attributes {stable_mosaic.version = 11 : i64} {
  func.func @mha_ln_kernel(%arg0: i32, %arg1: memref<1x8x32xf32, #tpu.memory_space<vmem>>, %arg2: memref<32x96xf32, #tpu.memory_space<vmem>>, %arg3: memref<1x96xf32, #tpu.memory_space<vmem>>, %arg4: memref<32x8xf32, #tpu.memory_space<vmem>>, %arg5: memref<8x32xf32, #tpu.memory_space<vmem>>, %arg6: memref<32x32xf32, #tpu.memory_space<vmem>>, %arg7: memref<1x32xf32, #tpu.memory_space<vmem>>, %arg8: memref<1x32xf32, #tpu.memory_space<vmem>>, %arg9: memref<1x32xf32, #tpu.memory_space<vmem>>, %arg10: memref<1x8x32xf32, #tpu.memory_space<vmem>>) attributes {dimension_semantics = [#tpu.dimension_semantics<parallel>], iteration_bounds = array<i64: 2>, scalar_prefetch = 0 : i64, scratch_operands = 0 : i64, tpu.core_type = #tpu.core_type<tc>, window_params = [{transform_indices = @transform_0, window_bounds = array<i64: 1, 8, 32>}, {pipeline_mode = #tpu.pipeline_mode<synchronous>, transform_indices = @transform_1, window_bounds = array<i64: 32, 96>}, {pipeline_mode = #tpu.pipeline_mode<synchronous>, transform_indices = @transform_2, window_bounds = array<i64: 1, 96>}, {pipeline_mode = #tpu.pipeline_mode<synchronous>, transform_indices = @transform_3, window_bounds = array<i64: 32, 8>}, {pipeline_mode = #tpu.pipeline_mode<synchronous>, transform_indices = @transform_4, window_bounds = array<i64: 8, 32>}, {pipeline_mode = #tpu.pipeline_mode<synchronous>, transform_indices = @transform_5, window_bounds = array<i64: 32, 32>}, {pipeline_mode = #tpu.pipeline_mode<synchronous>, transform_indices = @transform_6, window_bounds = array<i64: 1, 32>}, {pipeline_mode = #tpu.pipeline_mode<synchronous>, transform_indices = @transform_7, window_bounds = array<i64: 1, 32>}, {pipeline_mode = #tpu.pipeline_mode<synchronous>, transform_indices = @transform_8, window_bounds = array<i64: 1, 32>}, {transform_indices = @transform_9, window_bounds = array<i64: 1, 8, 32>}]} {
    %c0 = arith.constant 0 : index
    %c0_0 = arith.constant 0 : index
    %c0_1 = arith.constant 0 : index
    %0 = vector.load %arg1[%c0, %c0_0, %c0_1] : memref<1x8x32xf32, #tpu.memory_space<vmem>>, vector<1x8x32xf32>
    %1 = vector.shape_cast %0 : vector<1x8x32xf32> to vector<8x32xf32>
    %c0_2 = arith.constant 0 : index
    %c0_3 = arith.constant 0 : index
    %2 = vector.load %arg2[%c0_2, %c0_3] : memref<32x96xf32, #tpu.memory_space<vmem>>, vector<32x96xf32>
    %cst = arith.constant dense<0.000000e+00> : vector<8x96xf32>
    %3 = tpu.matmul %1, %2, %cst {dimension_numbers = #tpu.dot_dimension_numbers<[1], [0], [0], [1], [0, 0, 1, 1], [], []>} : vector<8x32xf32>, vector<32x96xf32>, vector<8x96xf32> -> vector<8x96xf32>
    %c0_4 = arith.constant 0 : index
    %c0_5 = arith.constant 0 : index
    %4 = vector.load %arg3[%c0_4, %c0_5] : memref<1x96xf32, #tpu.memory_space<vmem>>, vector<1x96xf32>
    %5 = vector.broadcast %4 : vector<1x96xf32> to vector<8x96xf32>
    %6 = arith.addf %3, %5 : vector<8x96xf32>
    %7 = vector.extract_strided_slice %6 {offsets = [0, 0], sizes = [8, 32], strides = [1, 1]} : vector<8x96xf32> to vector<8x32xf32>
    %8 = vector.shape_cast %7 : vector<8x32xf32> to vector<1x8x32xf32>
    %9 = vector.extract_strided_slice %6 {offsets = [0, 32], sizes = [8, 32], strides = [1, 1]} : vector<8x96xf32> to vector<8x32xf32>
    %10 = vector.shape_cast %9 : vector<8x32xf32> to vector<1x8x32xf32>
    %11 = vector.extract_strided_slice %6 {offsets = [0, 64], sizes = [8, 32], strides = [1, 1]} : vector<8x96xf32> to vector<8x32xf32>
    %12 = vector.shape_cast %11 : vector<8x32xf32> to vector<1x8x32xf32>
    %13 = vector.shape_cast %8 : vector<1x8x32xf32> to vector<1x8x1x32xf32>
    %14 = vector.shape_cast %10 : vector<1x8x32xf32> to vector<1x1x8x32xf32>
    %15 = vector.broadcast %13 : vector<1x8x1x32xf32> to vector<1x8x8x32xf32>
    %16 = vector.broadcast %14 : vector<1x1x8x32xf32> to vector<1x8x8x32xf32>
    %17 = arith.mulf %15, %16 : vector<1x8x8x32xf32>
    %18 = vector.shape_cast %17 : vector<1x8x8x32xf32> to vector<64x32xf32>
    %c0_6 = arith.constant 0 : index
    %c0_7 = arith.constant 0 : index
    %19 = vector.load %arg4[%c0_6, %c0_7] : memref<32x8xf32, #tpu.memory_space<vmem>>, vector<32x8xf32>
    %cst_8 = arith.constant dense<0.000000e+00> : vector<64x8xf32>
    %20 = tpu.matmul %18, %19, %cst_8 {dimension_numbers = #tpu.dot_dimension_numbers<[1], [0], [0], [1], [0, 0, 1, 1], [], []>} : vector<64x32xf32>, vector<32x8xf32>, vector<64x8xf32> -> vector<64x8xf32>
    %21 = vector.shape_cast %20 : vector<64x8xf32> to vector<1x8x8x8xf32>
    %cst_9 = arith.constant dense<0xFF800000> : vector<1x8x8xf32>
    %22 = vector.multi_reduction <maximumf>, %21, %cst_9 [2] : vector<1x8x8x8xf32> to vector<1x8x8xf32>
    %23 = vector.shape_cast %22 : vector<1x8x8xf32> to vector<1x8x1x8xf32>
    %24 = vector.broadcast %23 : vector<1x8x1x8xf32> to vector<1x8x8x8xf32>
    %25 = arith.subf %21, %24 : vector<1x8x8x8xf32>
    %26 = math.exp %25 : vector<1x8x8x8xf32>
    %cst_10 = arith.constant dense<0.000000e+00> : vector<1x8x8xf32>
    %27 = vector.multi_reduction <add>, %26, %cst_10 [2] : vector<1x8x8x8xf32> to vector<1x8x8xf32>
    %28 = vector.shape_cast %27 : vector<1x8x8xf32> to vector<1x8x1x8xf32>
    %29 = tpu.reciprocal %28 : vector<1x8x1x8xf32> -> vector<1x8x1x8xf32>
    %30 = vector.broadcast %29 : vector<1x8x1x8xf32> to vector<1x8x8x8xf32>
    %31 = arith.mulf %26, %30 : vector<1x8x8x8xf32>
    %32 = vector.shape_cast %31 : vector<1x8x8x8xf32> to vector<64x8xf32>
    %c0_11 = arith.constant 0 : index
    %c0_12 = arith.constant 0 : index
    %33 = vector.load %arg5[%c0_11, %c0_12] : memref<8x32xf32, #tpu.memory_space<vmem>>, vector<8x32xf32>
    %cst_13 = arith.constant dense<0.000000e+00> : vector<64x32xf32>
    %34 = tpu.matmul %32, %33, %cst_13 {dimension_numbers = #tpu.dot_dimension_numbers<[1], [0], [0], [1], [0, 0, 1, 1], [], []>} : vector<64x8xf32>, vector<8x32xf32>, vector<64x32xf32> -> vector<64x32xf32>
    %35 = vector.shape_cast %34 : vector<64x32xf32> to vector<1x8x8x32xf32>
    %36 = vector.shape_cast %12 : vector<1x8x32xf32> to vector<1x1x8x32xf32>
    %37 = vector.broadcast %36 : vector<1x1x8x32xf32> to vector<1x8x8x32xf32>
    %38 = arith.mulf %35, %37 : vector<1x8x8x32xf32>
    %cst_14 = arith.constant dense<0.000000e+00> : vector<1x8x32xf32>
    %39 = vector.multi_reduction <add>, %38, %cst_14 [2] : vector<1x8x8x32xf32> to vector<1x8x32xf32>
    %c0_15 = arith.constant 0 : index
    %c0_16 = arith.constant 0 : index
    %40 = vector.load %arg7[%c0_15, %c0_16] : memref<1x32xf32, #tpu.memory_space<vmem>>, vector<1x32xf32>
    %41 = vector.broadcast %40 : vector<1x32xf32> to vector<8x32xf32>
    %42 = arith.addf %1, %41 : vector<8x32xf32>
    %43 = vector.shape_cast %39 : vector<1x8x32xf32> to vector<8x32xf32>
    %c0_17 = arith.constant 0 : index
    %c0_18 = arith.constant 0 : index
    %44 = vector.load %arg6[%c0_17, %c0_18] : memref<32x32xf32, #tpu.memory_space<vmem>>, vector<32x32xf32>
    %cst_19 = arith.constant dense<0.000000e+00> : vector<8x32xf32>
    %45 = tpu.matmul %43, %44, %cst_19 {dimension_numbers = #tpu.dot_dimension_numbers<[1], [0], [0], [1], [0, 0, 1, 1], [], []>} : vector<8x32xf32>, vector<32x32xf32>, vector<8x32xf32> -> vector<8x32xf32>
    %46 = arith.addf %42, %45 : vector<8x32xf32>
    %cst_20 = arith.constant dense<0.000000e+00> : vector<8xf32>
    %47 = vector.multi_reduction <add>, %46, %cst_20 [1] : vector<8x32xf32> to vector<8xf32>
    %48 = vector.shape_cast %47 : vector<8xf32> to vector<8x1xf32>
    %cst_21 = arith.constant 3.200000e+01 : f32
    %49 = vector.broadcast %cst_21 : f32 to vector<8x1xf32>
    %50 = arith.divf %48, %49 : vector<8x1xf32>
    %51 = arith.mulf %46, %46 : vector<8x32xf32>
    %cst_22 = arith.constant dense<0.000000e+00> : vector<8xf32>
    %52 = vector.multi_reduction <add>, %51, %cst_22 [1] : vector<8x32xf32> to vector<8xf32>
    %53 = vector.shape_cast %52 : vector<8xf32> to vector<8x1xf32>
    %cst_23 = arith.constant 3.200000e+01 : f32
    %54 = vector.broadcast %cst_23 : f32 to vector<8x1xf32>
    %55 = arith.divf %53, %54 : vector<8x1xf32>
    %56 = arith.mulf %50, %50 : vector<8x1xf32>
    %57 = arith.subf %55, %56 : vector<8x1xf32>
    %58 = vector.broadcast %50 : vector<8x1xf32> to vector<8x32xf32>
    %59 = arith.subf %46, %58 : vector<8x32xf32>
    %cst_24 = arith.constant 9.99999974E-6 : f32
    %60 = vector.broadcast %cst_24 : f32 to vector<8x1xf32>
    %61 = arith.addf %57, %60 : vector<8x1xf32>
    %62 = math.rsqrt %61 : vector<8x1xf32>
    %63 = vector.broadcast %62 : vector<8x1xf32> to vector<8x32xf32>
    %64 = arith.mulf %59, %63 : vector<8x32xf32>
    %c0_25 = arith.constant 0 : index
    %c0_26 = arith.constant 0 : index
    %65 = vector.load %arg8[%c0_25, %c0_26] : memref<1x32xf32, #tpu.memory_space<vmem>>, vector<1x32xf32>
    %66 = vector.broadcast %65 : vector<1x32xf32> to vector<8x32xf32>
    %67 = arith.mulf %64, %66 : vector<8x32xf32>
    %c0_27 = arith.constant 0 : index
    %c0_28 = arith.constant 0 : index
    %68 = vector.load %arg9[%c0_27, %c0_28] : memref<1x32xf32, #tpu.memory_space<vmem>>, vector<1x32xf32>
    %69 = vector.broadcast %68 : vector<1x32xf32> to vector<8x32xf32>
    %70 = arith.addf %67, %69 : vector<8x32xf32>
    %71 = vector.shape_cast %70 : vector<8x32xf32> to vector<1x8x32xf32>
    %c0_29 = arith.constant 0 : index
    %c0_30 = arith.constant 0 : index
    %c0_31 = arith.constant 0 : index
    %72 = vector.load %arg10[%c0_29, %c0_30, %c0_31] : memref<1x8x32xf32, #tpu.memory_space<vmem>>, vector<1x8x32xf32>
    tpu.vector_store %arg10[%c0_29, %c0_30, %c0_31], %71 {strides = array<i32>} : memref<1x8x32xf32, #tpu.memory_space<vmem>>, vector<1x8x32xf32>,
    return
  }
  func.func @transform_0(%arg0: i32) -> (i32, i32, i32) {
    %c0_i32 = arith.constant 0 : i32
    %c0_i32_0 = arith.constant 0 : i32
    %c0_i32_1 = arith.constant 0 : i32
    return %arg0, %c0_i32, %c0_i32_0 : i32, i32, i32
  }
  func.func @transform_1(%arg0: i32) -> (i32, i32) {
    %c0_i32 = arith.constant 0 : i32
    %c0_i32_0 = arith.constant 0 : i32
    %c0_i32_1 = arith.constant 0 : i32
    return %c0_i32, %c0_i32_0 : i32, i32
  }
  func.func @transform_2(%arg0: i32) -> (i32, i32) {
    %c0_i32 = arith.constant 0 : i32
    %c0_i32_0 = arith.constant 0 : i32
    %c0_i32_1 = arith.constant 0 : i32
    return %c0_i32, %c0_i32_0 : i32, i32
  }
  func.func @transform_3(%arg0: i32) -> (i32, i32) {
    %c0_i32 = arith.constant 0 : i32
    %c0_i32_0 = arith.constant 0 : i32
    %c0_i32_1 = arith.constant 0 : i32
    return %c0_i32, %c0_i32_0 : i32, i32
  }
  func.func @transform_4(%arg0: i32) -> (i32, i32) {
    %c0_i32 = arith.constant 0 : i32
    %c0_i32_0 = arith.constant 0 : i32
    %c0_i32_1 = arith.constant 0 : i32
    return %c0_i32, %c0_i32_0 : i32, i32
  }
  func.func @transform_5(%arg0: i32) -> (i32, i32) {
    %c0_i32 = arith.constant 0 : i32
    %c0_i32_0 = arith.constant 0 : i32
    %c0_i32_1 = arith.constant 0 : i32
    return %c0_i32, %c0_i32_0 : i32, i32
  }
  func.func @transform_6(%arg0: i32) -> (i32, i32) {
    %c0_i32 = arith.constant 0 : i32
    %c0_i32_0 = arith.constant 0 : i32
    %c0_i32_1 = arith.constant 0 : i32
    return %c0_i32, %c0_i32_0 : i32, i32
  }
  func.func @transform_7(%arg0: i32) -> (i32, i32) {
    %c0_i32 = arith.constant 0 : i32
    %c0_i32_0 = arith.constant 0 : i32
    %c0_i32_1 = arith.constant 0 : i32
    return %c0_i32, %c0_i32_0 : i32, i32
  }
  func.func @transform_8(%arg0: i32) -> (i32, i32) {
    %c0_i32 = arith.constant 0 : i32
    %c0_i32_0 = arith.constant 0 : i32
    %c0_i32_1 = arith.constant 0 : i32
    return %c0_i32, %c0_i32_0 : i32, i32
  }
  func.func @transform_9(%arg0: i32) -> (i32, i32, i32) {
    %c0_i32 = arith.constant 0 : i32
    %c0_i32_0 = arith.constant 0 : i32
    %c0_i32_1 = arith.constant 0 : i32
    return %arg0, %c0_i32, %c0_i32_0 : i32, i32, i32
  }
}

</mosaic_0001>

<bundles_post_ra>
// kernel: _cross_lingual_alignment.1
= control target key start
LH: loop header
LB: loop body
LE: loop exit
PB: predicated region body
PF: predicated region fallthrough
CT: control target
= control target key end

     0   :  { %14 = vsyncpa [#allocation3], 0  ;;  %s1786_s0 = inlined_call_operand.vmem [shape: f32[2,8,32], index: 0, kind: input, shape index: {}]   ;;  %s1787_s1 = inlined_call_operand.vmem [shape: f32[32,96], index: 1, kind: input, shape index: {}]   ;;  %s1788_s2 = inlined_call_operand.vmem [shape: f32[1,96], index: 2, kind: input, shape index: {}]   ;;  %s1789_s3 = inlined_call_operand.vmem [shape: f32[32,8], index: 3, kind: input, shape index: {}]   ;;  %s1790_s4 = inlined_call_operand.vmem [shape: f32[8,32], index: 4, kind: input, shape index: {}]   ;;  %s1791_s5 = inlined_call_operand.vmem [shape: f32[32,32], index: 5, kind: input, shape index: {}]   ;;  %s1792_s6 = inlined_call_operand.vmem [shape: f32[1,32], index: 6, kind: input, shape index: {}]   ;;  %s1793_s7 = inlined_call_operand.vmem [shape: f32[1,32], index: 7, kind: input, shape index: {}]   ;;  %s1794_s8 = inlined_call_operand.vmem [shape: f32[1,32], index: 8, kind: input, shape index: {}]   ;;  %s1795_s9 = inlined_call_operand.hbm [shape: f32[2,8,32], index: 9, kind: output, shape index: {}]  }
   0x1   :  { %16 = vsyncpa [#allocation3 + $0x1], 0  ;;  %s1550_s30 = smov 0   ;;  %s1552_s10 = smov 0  }
   0x2   :  { %s1554_s11 = smov 0   ;;  %s1556_s12 = smov 0  }
   0x3 LB: > { %s1571_s13 = sadd.s32 4294967295, %s1491_s12   ;;  %s1211_s14 = sadd.s32 4294967294, %s1491_s12   ;;  %s1491_s12 = sphi %s1556_s12, %s1801_s12   ;;  %s1487_s11 = sphi %s1554_s11, %s1800_s11   ;;  %s1483_s10 = sphi %s1552_s10, %s1799_s10   ;;  %s1479_s30 = sphi %s1550_s30, %s1798_s30  }
   0x4   : > { %s1575_s15 = sadd.s32 1, %s1491_s12   ;;  %s223_s16 = sadd.s32 1, %s1487_s11 }
   0x5   : > { %s220_s17 = ssub.s32 %s1491_s12, %s1575_s15  ;;  %p233_p0 = scmp.ne.s32.totalorder %s1487_s11, %s1483_s10 }
   0x6   : > { %p221_p1 = scmp.eq.s32.totalorder %s220_s17, 0  ;;  %p234_p2 = scmp.eq.s32.totalorder %s1571_s13, 1 }
   0x7   : > { %p239_p3 = scmp.ne.s32.totalorder %s1483_s10, %s1479_s30  ;;  %p240_p4 = scmp.eq.s32.totalorder %s1211_s14, 1 }
   0x8   : > { %s1586_s18 = scalar_select %p221_p1, %s1487_s11, %s223_s16  }
   0x9   : > { %p1588_p5 = por %p234_p2, %p233_p0  ;;  %p1592_p6 = por %p240_p4, %p239_p3 }
   0xa   : > { %p1214_p7 = scmp.ge.s32.totalorder %s1491_s12, 1  ;;  %p289_p8 = scmp.lt.s32.totalorder %s1491_s12, 3 }
   0xc   : > { %p290_p9 = pnand %p1214_p7, %p289_p8 }
   0xd   : > { %v329_v0 = vld [vmem:[%s1787_s1] sm:$0xff] (!%p290_p9)  ;;  %v330_v1 = vld [vmem:[%s1787_s1 + $0x8] sm:$0xff] (!%p290_p9)  ;;  %v331_v2 = vld [vmem:[%s1787_s1 + $0x10] sm:$0xff] (!%p290_p9)  ;;  %v1493_v3 = vmov (!%p290_p9), 0.0|0.0   ;;  %vm1494_vm0 = vmmov (!%p290_p9), 0   ;;  %v1495_v6 = vmov (!%p290_p9), 0.0   ;;  %v419_v21 = vlaneseq (!%p290_p9) }
   0xe   : > { %293 = sbr.rel (%p290_p9) target bundleno = 1268 (0x4f4), region = 56  ;;  %1330 = vmatprep.subr.bf16.mxu0 (!%p290_p9), %v1493_v3  ;;  %v1331_v4 = vpack.c.bf16 (!%p290_p9), %v330_v1, %v329_v0  ;;  %v332_v5 = vld [vmem:[%s1787_s1 + $0x18] sm:$0xff] (!%p290_p9)  ;;  %1282 = vmatprep.mubr.msk.f32.mxu0 (!%p290_p9), %vm1494_vm0, %v1495_v6  ;;  %p324_p10 = scmp.lt.s32.totalorder (!%p290_p9), %s1571_s13, 1  ;;  %vm340_vm1 = vcmask (!%p290_p9), 261120   ;;  %v515_v9 = vld [vmem:[%s1789_s3] sm:$0xff] (!%p290_p9)  ;;  %v516_v10 = vld [vmem:[%s1789_s3 + $0x8] sm:$0xff] (!%p290_p9) }
   0xf   : > { %v1334_v7 = vpack.c.bf16 (!%p290_p9), %v332_v5, %v331_v2  ;;  %v517_v11 = vld [vmem:[%s1789_s3 + $0x10] sm:$0xff] (!%p290_p9)  ;;  %v1336_v12 = vpack.c.bf16 (!%p290_p9), %v516_v10, %v515_v9  ;;  %v518_v13 = vld [vmem:[%s1789_s3 + $0x18] sm:$0xff] (!%p290_p9)  ;;  %v1217_v15 = vld [vmem:[%s1788_s2] ss:$0 sm:$0xff] (!%p290_p9)  ;;  %s1496_s17 = smov (!%p290_p9), 96   ;;  %v420_v23 = vshrl.u32 (!%p290_p9), %v419_v21, 7 }
  0x10   : > { %1332 = vmatpush3.bf16.msra.mxu0 (!%p290_p9), %v1331_v4  ;;  %v1340_v14 = vpack.c.bf16 (!%p290_p9), %v518_v13, %v517_v11  ;;  %v1498_v19 = vmov (!%p290_p9), 1966171168   ;;  %v801_v56 = vld [vmem:[%s1790_s4] sm:$0xff] (!%p290_p9)  ;;  %vm648_vm2 = vcmask (!%p290_p9), 64512   ;;  %vm1018_vm3 = vcmask (!%p290_p9), 1041409   ;;  %s321_s22 = sand.u32 (!%p290_p9), 1, %s1483_s10  }
  0x11   : > { %1333 = vmatprep.subr.bf16.mxu0 (!%p290_p9), %v1493_v3  ;;  %1337 = vmatprep.subr.bf16.mxu1 (!%p290_p9), %v1336_v12  ;;  %v417_v20 = vunpack.c.l.s4 (!%p290_p9), %v1498_v19  ;;  %v466_v29 = vsub.s32 (!%p290_p9), 0, %v420_v23  ;;  %vm1020_vm4 = vcmask (!%p290_p9), 1042434   ;;  %vm1022_vm5 = vcmask (!%p290_p9), 1043459   ;;  %s1215_s23 = sshll.u32 (!%p290_p9), %s321_s22, 3  ;;  %s1240_s28 = sshll.u32 (!%p290_p9), %s1571_s13, 7 }
  0x12   : > { %1339 = vmatpush3.bf16.msra.mxu1 (!%p290_p9), %v1336_v12  ;;  %vm1024_vm6 = vcmask (!%p290_p9), 1044484   ;;  %vm1026_vm7 = vcmask (!%p290_p9), 1045509   ;;  %vm1028_vm8 = vcmask (!%p290_p9), 1046534   ;;  %vm1030_vm9 = vcmask (!%p290_p9), 1047559   ;;  %s1139_s24 = scalar_lea.sflag (!%p290_p9), [#allocation3], %s321_s22 }
  0x13   : > { %1341 = vmatprep.subr.bf16.mxu1 (!%p290_p9), %v1340_v14  ;;  %v418_v22 = vunpack.c.0.s8 (!%p290_p9), %v417_v20 }
  0x14   : > { %1335 = vmatpush3.bf16.msra.mxu0 (!%p290_p9), %v1334_v7 }
  0x15   : > { %s325_s29 = scalar_select %p324_p10, %s1571_s13, 1  ;;  %v421_v24 = vsub.s32 %v418_v22, %v420_v23  ;;  %1305 = vmatprep.subr.mxu0 %v801_v56 }
  0x16   : > { %1343 = vmatpush3.bf16.msra.mxu1 %v1340_v14  ;;  %s1499_s13 = smov [#allocation2]  }
  0x17   : > { %s1216_s14 = sshll.u32 %s325_s29, 3  ;;  %1344 = vmatprep.subr.bf16.mxu1 %v1493_v3  ;;  %s323_s29 = scalar_lea.vmem [#allocation2], %s1215_s23 }
  0x18   : > { %s327_s21 = scalar_lea.vmem %s1786_s0, %s1216_s14  ;;  %s1152_s14 = sshll.u32 %s323_s29, 4  ;;  %s1745_s14 = int_to_ptr.vmem [resolvable:$true] %s1152_s14 }
  0x19   : > { %v1619_v8 = vld [vmem:[%s327_s21] sm:$0xff]  ;;  %s1497_s21 = smov 64   ;;  %s1429_s25 = scalar_lea.vmem %s1745_s14, 128 }
  0x1a   : > { %1283 = vmatmul.mubr.msk.f32.vlgmr.msra.gmra.mrb[0].mxu0 %vm340_vm1, %v1619_v8  ;;  %p1430_p11 = scmp.ne.s32.totalorder %s1745_s14, %s1429_s25  ;;  %s1433_s23 = sshll.u32 %s1499_s13, 4  ;;  %s1434_s23 = int_to_ptr.vmem [resolvable:$false] %s1433_s23 }
  0x1b   : > { %1306 = vmatpush3.msra.mxu0 %v801_v56  ;;  %s1435_s26 = scalar_lea.vmem %s1434_s23, 256  ;;  %p1436_p0 = scmp.lt.s32.totalorder %s1745_s14, %s1434_s23 }
  0x1c   : > { %p1431_p12 = pnand %p1430_p11, %p1588_p5  ;;  %p1437_p1 = scmp.lt.s32.totalorder %s1435_s26, %s1429_s25 }
  0x1e   : > { %p1432_p13 = pneg %p1431_p12  ;;  %p1438_p2 = por %p1437_p1, %p1436_p0 }
  0x20   : > { %p1439_p3 = pnand %p1438_p2, %p1432_p13 }
  0xed   : > { %v410_v16 = vpop.f32.mrb[0].mxu0 }
  0xee   : > { %v411_v17 = vadd.f32 %v1217_v15, %v410_v16  ;;  %v1284_v18 = vpop.f32.mrb[1].mxu0 }
  0xf0   : > { %504 = vrot.lane.b32.xlu0 %v411_v17, %s1496_s17  ;;  %v422_v25 = vrot.slane %v411_v17, %v421_v24  ;;  %v415_v27 = vcombine.high %v411_v17, %v411_v17 }
  0xf2   : > { %v430_v26 = vcombine.high %v422_v25, %v422_v25  ;;  %v438_v28 = vrot.slane %v422_v25, %v421_v24  ;;  %v429_v31 = vrot.slane %v415_v27, %v421_v24 }
  0xf4   : > { %931 = vrot.lane.b32.xlu0 %v411_v17, %s1497_s21  ;;  %v452_v30 = vrot.slane %v430_v26, %v421_v24  ;;  %v460_v32 = vcombine.high %v438_v28, %v438_v28  ;;  %v467_v33 = vrot.slane %v438_v28, %v466_v29  ;;  %v431_v35 = vcombine.high %v429_v31, %v429_v31  ;;  %s1743_s21 = scalar_lea.hbm %s1795_s9, %s1240_s28 }
  0xf5   : > { %v445_v41 = vrot.slane %v429_v31, %v421_v24 }
  0xf6   : > { %v471_v34 = vrot.slane %v452_v30, %v466_v29  ;;  %v462_v37 = vcombine.high %v452_v30, %v452_v30  ;;  %v475_v40 = vrot.slane %v460_v32, %v466_v29  ;;  %v459_v44 = vrot.slane %v431_v35, %v421_v24 }
  0xf7   : > { %v483_v45 = vrot.slane %v445_v41, %v466_v29  ;;  %v461_v46 = vcombine.high %v445_v41, %v445_v41 }
  0xf8   : > { %v479_v43 = vrot.slane %v462_v37, %v466_v29  ;;  %v487_v49 = vrot.slane %v459_v44, %v466_v29  ;;  %v463_v50 = vcombine.high %v459_v44, %v459_v44 }
  0xf9   : > { %v491_v51 = vrot.slane %v461_v46, %v466_v29 }
  0xfa   : > { %v495_v54 = vrot.slane %v463_v50, %v466_v29 }
 0x162   : > { %v505_v36 = vpop.permute.xlu0 %504 }
 0x163   : > { %v507_v38 = vmul.f32 %v505_v36, %v467_v33  ;;  %v508_v39 = vmul.f32 %v505_v36, %v471_v34  ;;  %v509_v42 = vmul.f32 %v505_v36, %v475_v40  ;;  %v510_v47 = vmul.f32 %v505_v36, %v479_v43 }
 0x164   : > { %v511_v48 = vmul.f32 %v505_v36, %v483_v45  ;;  %v512_v52 = vmul.f32 %v505_v36, %v487_v49  ;;  %v513_v53 = vmul.f32 %v505_v36, %v491_v51  ;;  %v514_v55 = vmul.f32 %v505_v36, %v495_v54 }
 0x165   : > { %1293 = vmatprep.mubr.msk.f32.mxu1 %vm340_vm1, %v507_v38 }
 0x166   : > { %1294 = vmatmul.mubr.msk.f32.vlgmr.msra.gmra.mrb[0].mxu1 %vm340_vm1, %v508_v39 }
 0x167   : > { %1296 = vmatprep.mubr.msk.f32.mxu1 %vm340_vm1, %v509_v42 }
 0x16a   : > { %1297 = vmatmul.mubr.msk.f32.gmra.mrb[2].mxu1 %vm340_vm1, %v510_v47 }
 0x16b   : > { %1299 = vmatprep.mubr.msk.f32.mxu1 %vm340_vm1, %v511_v48 }
 0x16e   : > { %1300 = vmatmul.mubr.msk.f32.gmra.mrb[4].mxu1 %vm340_vm1, %v512_v52 }
 0x16f   : > { %1302 = vmatprep.mubr.msk.f32.mxu1 %vm340_vm1, %v513_v53 }
 0x172   : > { %1303 = vmatmul.mubr.msk.f32.gmra.mrb[6].mxu1 %vm340_vm1, %v514_v55 }
 0x173   : > { %1327 = vmatprep.mubr.msk.f32.mxu1 %vm1494_vm0, %v1495_v6 }
 0x239   : > { %v1295_v57 = vpop.f32.mrb[0].mxu1 }
 0x23a   : > { %v656_v58 = vsel %vm648_vm2, %v1295_v57, -inf  ;;  %v609_v59 = vpop.f32.mrb[1].mxu1 }
 0x23b   : > { %v657_v60 = vrot.slane %v656_v58, 4  ;;  %v649_v61 = vsel %vm648_vm2, %v609_v59, -inf }
 0x23c   : > { %v650_v62 = vrot.slane %v649_v61, 4 }
 0x23d   : > { %v658_v63 = vmax.f32 %v656_v58, %v657_v60  ;;  %v1298_v0 = vpop.f32.mrb[2].mxu1 }
 0x23e   : > { %v651_v1 = vmax.f32 %v649_v61, %v650_v62  ;;  %v670_v2 = vsel %vm648_vm2, %v1298_v0, -inf  ;;  %v619_v4 = vpop.f32.mrb[3].mxu1 }
 0x23f   : > { %v659_v5 = vrot.slane %v658_v63, 2  ;;  %v671_v6 = vrot.slane %v670_v2, 4  ;;  %v663_v7 = vsel %vm648_vm2, %v619_v4, -inf }
 0x240   : > { %v652_v9 = vrot.slane %v651_v1, 2  ;;  %v664_v10 = vrot.slane %v663_v7, 4 }
 0x241   : > { %v660_v11 = vmax.f32 %v658_v63, %v659_v5  ;;  %v672_v12 = vmax.f32 %v670_v2, %v671_v6  ;;  %v1301_v13 = vpop.f32.mrb[4].mxu1 }
 0x242   : > { %v653_v14 = vmax.f32 %v651_v1, %v652_v9  ;;  %v665_v15 = vmax.f32 %v663_v7, %v664_v10  ;;  %v684_v16 = vsel %vm648_vm2, %v1301_v13, -inf  ;;  %v629_v17 = vpop.f32.mrb[5].mxu1 }
 0x243   : > { %v661_v18 = vrot.slane %v660_v11, 1  ;;  %v673_v19 = vrot.slane %v672_v12, 2  ;;  %v685_v20 = vrot.slane %v684_v16, 4  ;;  %v677_v21 = vsel %vm648_vm2, %v629_v17, -inf }
 0x244   : > { %v654_v22 = vrot.slane %v653_v14, 1  ;;  %v666_v23 = vrot.slane %v665_v15, 2  ;;  %v678_v24 = vrot.slane %v677_v21, 4 }
 0x245   : > { %v662_v25 = vmax.f32 %v660_v11, %v661_v18  ;;  %v674_v26 = vmax.f32 %v672_v12, %v673_v19  ;;  %v686_v27 = vmax.f32 %v684_v16, %v685_v20  ;;  %v1304_v28 = vpop.f32.mrb[6].mxu1 }
 0x246   : > { %v655_v29 = vmax.f32 %v653_v14, %v654_v22  ;;  %v667_v30 = vmax.f32 %v665_v15, %v666_v23  ;;  %v679_v31 = vmax.f32 %v677_v21, %v678_v24  ;;  %v698_v32 = vsel %vm648_vm2, %v1304_v28, -inf  ;;  %v639_v33 = vpop.f32.mrb[7].mxu1 }
 0x247   : > { %v706_v34 = vsub.f32 %v1295_v57, %v662_v25  ;;  %v675_v35 = vrot.slane %v674_v26, 1  ;;  %v687_v36 = vrot.slane %v686_v27, 2  ;;  %v699_v37 = vrot.slane %v698_v32, 4 }
 0x248   : > { %v705_v38 = vsub.f32 %v609_v59, %v655_v29  ;;  %v668_v39 = vrot.slane %v667_v30, 1  ;;  %v680_v40 = vrot.slane %v679_v31, 2  ;;  %v691_v41 = vsel %vm648_vm2, %v639_v33, -inf }
 0x249   : > { %v715_v42 = vmul.f32 1.442695, %v706_v34  ;;  %v676_v43 = vmax.f32 %v674_v26, %v675_v35  ;;  %v688_v44 = vmax.f32 %v686_v27, %v687_v36  ;;  %v700_v45 = vmax.f32 %v698_v32, %v699_v37 }
 0x24a   : > { %v713_v46 = vmul.f32 1.442695, %v705_v38  ;;  %v669_v47 = vmax.f32 %v667_v30, %v668_v39  ;;  %v681_v48 = vmax.f32 %v679_v31, %v680_v40  ;;  %v692_v49 = vrot.slane %v691_v41, 4 }
 0x24b   : > { %1395 = vpow2.f32 %v715_v42  ;;  %v708_v50 = vsub.f32 %v1298_v0, %v676_v43  ;;  %v689_v51 = vrot.slane %v688_v44, 1  ;;  %v701_v52 = vrot.slane %v700_v45, 2 }
 0x24c   : > { %1397 = vpow2.f32 %v713_v46  ;;  %v707_v53 = vsub.f32 %v619_v4, %v669_v47  ;;  %v682_v54 = vrot.slane %v681_v48, 1  ;;  %v693_v55 = vmax.f32 %v691_v41, %v692_v49 }
 0x24d   : > { %v719_v56 = vmul.f32 1.442695, %v708_v50  ;;  %v690_v57 = vmax.f32 %v688_v44, %v689_v51  ;;  %v702_v58 = vmax.f32 %v700_v45, %v701_v52 }
 0x24e   : > { %v717_v59 = vmul.f32 1.442695, %v707_v53  ;;  %v683_v60 = vmax.f32 %v681_v48, %v682_v54  ;;  %v694_v61 = vrot.slane %v693_v55, 2 }
 0x24f   : > { %1399 = vpow2.f32 %v719_v56  ;;  %v710_v62 = vsub.f32 %v1301_v13, %v690_v57  ;;  %v703_v63 = vrot.slane %v702_v58, 1 }
 0x250   : > { %1401 = vpow2.f32 %v717_v59  ;;  %v709_v1 = vsub.f32 %v629_v17, %v683_v60  ;;  %v695_v2 = vmax.f32 %v693_v55, %v694_v61 }
 0x251   : > { %v723_v5 = vmul.f32 1.442695, %v710_v62  ;;  %v704_v0 = vmax.f32 %v702_v58, %v703_v63 }
 0x252   : > { %v721_v6 = vmul.f32 1.442695, %v709_v1  ;;  %v696_v7 = vrot.slane %v695_v2, 1 }
 0x253   : > { %1403 = vpow2.f32 %v723_v5  ;;  %v712_v4 = vsub.f32 %v1304_v28, %v704_v0 }
 0x254   : > { %1405 = vpow2.f32 %v721_v6  ;;  %v697_v9 = vmax.f32 %v695_v2, %v696_v7 }
 0x255   : > { %v1660_v10 = vpop.eup %1395  ;;  %v727_v11 = vmul.f32 1.442695, %v712_v4 }
 0x256   : > { %v1662_v12 = vpop.eup %1397  ;;  %v736_v13 = vsel %vm648_vm2, %v1660_v10, 0.0  ;;  %v711_v14 = vsub.f32 %v639_v33, %v697_v9 }
 0x257   : > { %v737_v15 = vrot.slane %v736_v13, 4  ;;  %v729_v16 = vsel %vm648_vm2, %v1662_v12, 0.0  ;;  %1407 = vpow2.f32 %v727_v11 }
 0x258   : > { %v730_v17 = vrot.slane %v729_v16, 4  ;;  %v725_v18 = vmul.f32 1.442695, %v711_v14 }
 0x259   : > { %v1668_v19 = vpop.eup %1399  ;;  %v738_v20 = vadd.f32 %v737_v15, %v736_v13 }
 0x25a   : > { %v1670_v21 = vpop.eup %1401  ;;  %v731_v22 = vadd.f32 %v730_v17, %v729_v16  ;;  %v750_v23 = vsel %vm648_vm2, %v1668_v19, 0.0  ;;  %1409 = vpow2.f32 %v725_v18 }
 0x25b   : > { %v739_v24 = vrot.slane %v738_v20, 2  ;;  %v751_v25 = vrot.slane %v750_v23, 4  ;;  %v743_v26 = vsel %vm648_vm2, %v1670_v21, 0.0 }
 0x25c   : > { %v732_v27 = vrot.slane %v731_v22, 2  ;;  %v744_v28 = vrot.slane %v743_v26, 4 }
 0x25d   : > { %v1676_v29 = vpop.eup %1403  ;;  %v740_v30 = vadd.f32 %v739_v24, %v738_v20  ;;  %v752_v31 = vadd.f32 %v751_v25, %v750_v23 }
 0x25e   : > { %v1678_v32 = vpop.eup %1405  ;;  %v733_v33 = vadd.f32 %v732_v27, %v731_v22  ;;  %v745_v34 = vadd.f32 %v744_v28, %v743_v26  ;;  %v764_v35 = vsel %vm648_vm2, %v1676_v29, 0.0 }
 0x25f   : > { %v741_v36 = vrot.slane %v740_v30, 1  ;;  %v753_v37 = vrot.slane %v752_v31, 2  ;;  %v765_v38 = vrot.slane %v764_v35, 4  ;;  %v757_v39 = vsel %vm648_vm2, %v1678_v32, 0.0 }
 0x260   : > { %v734_v40 = vrot.slane %v733_v33, 1  ;;  %v746_v41 = vrot.slane %v745_v34, 2  ;;  %v758_v42 = vrot.slane %v757_v39, 4 }
 0x261   : > { %v1684_v43 = vpop.eup %1407  ;;  %v742_v44 = vadd.f32 %v741_v36, %v740_v30  ;;  %v754_v45 = vadd.f32 %v753_v37, %v752_v31  ;;  %v766_v46 = vadd.f32 %v765_v38, %v764_v35  ;;  %v1009_v35 = vld [vmem:[%s1791_s5 + $0x18] sm:$0xff]  ;;  %v932_v37 = vpop.permute.xlu0 %931 }
 0x262   : > { %v735_v47 = vadd.f32 %v734_v40, %v733_v33  ;;  %v747_v48 = vadd.f32 %v746_v41, %v745_v34  ;;  %v759_v49 = vadd.f32 %v758_v42, %v757_v39  ;;  %v778_v50 = vsel %vm648_vm2, %v1684_v43, 0.0  ;;  %v1008_v34 = vld [vmem:[%s1791_s5 + $0x10] sm:$0xff] }
 0x263   : > { %1411 = vrcp.f32 %v742_v44  ;;  %v755_v51 = vrot.slane %v754_v45, 1  ;;  %v767_v52 = vrot.slane %v766_v46, 2  ;;  %v779_v53 = vrot.slane %v778_v50, 4 }
 0x264   : > { %v1410_v54 = vpop.eup %1409  ;;  %v748_v55 = vrot.slane %v747_v48, 1  ;;  %v760_v56 = vrot.slane %v759_v49, 2  ;;  %1413 = vrcp.f32 %v735_v47  ;;  %v1348_v36 = vpack.c.bf16 %v1009_v35, %v1008_v34 }
 0x265   : > { %v756_v57 = vadd.f32 %v755_v51, %v754_v45  ;;  %v768_v58 = vadd.f32 %v767_v52, %v766_v46  ;;  %v780_v59 = vadd.f32 %v779_v53, %v778_v50  ;;  %v771_v60 = vsel %vm648_vm2, %v1410_v54, 0.0 }
 0x266   : > { %v749_v61 = vadd.f32 %v748_v55, %v747_v48  ;;  %v761_v62 = vadd.f32 %v760_v56, %v759_v49  ;;  %v772_v63 = vrot.slane %v771_v60, 4 }
 0x267   : > { %v769_v1 = vrot.slane %v768_v58, 1  ;;  %v781_v2 = vrot.slane %v780_v59, 2  ;;  %1415 = vrcp.f32 %v756_v57 }
 0x268   : > { %v762_v5 = vrot.slane %v761_v62, 1  ;;  %v773_v0 = vadd.f32 %v772_v63, %v771_v60  ;;  %1417 = vrcp.f32 %v749_v61 }
 0x269   : > { %v770_v6 = vadd.f32 %v769_v1, %v768_v58  ;;  %v782_v7 = vadd.f32 %v781_v2, %v780_v59 }
 0x26a   : > { %v763_v4 = vadd.f32 %v762_v5, %v761_v62  ;;  %v774_v9 = vrot.slane %v773_v0, 2 }
 0x26b   : > { %v783_v11 = vrot.slane %v782_v7, 1  ;;  %1419 = vrcp.f32 %v770_v6 }
 0x26c   : > { %v775_v13 = vadd.f32 %v774_v9, %v773_v0  ;;  %1421 = vrcp.f32 %v763_v4 }
 0x26d   : > { %v1412_v14 = vpop.eup %1411  ;;  %v784_v15 = vadd.f32 %v783_v11, %v782_v7 }
 0x26e   : > { %v1414_v16 = vpop.eup %1413  ;;  %v776_v17 = vrot.slane %v775_v13, 1  ;;  %v794_v22 = vmul.f32 %v1412_v14, %v1660_v10 }
 0x26f   : > { %v793_v18 = vmul.f32 %v1414_v16, %v1662_v12  ;;  %1423 = vrcp.f32 %v784_v15 }
 0x270   : > { %v777_v20 = vadd.f32 %v776_v17, %v775_v13 }
 0x271   : > { %v1416_v23 = vpop.eup %1415  ;;  %1307 = vmatprep.mubr.msk.f32.mxu0 %vm648_vm2, %v793_v18 }
 0x272   : > { %v1418_v24 = vpop.eup %1417  ;;  %1308 = vmatmul.mubr.msk.f32.vlgmr.msra.gmra.mrb[2].mxu0 %vm648_vm2, %v794_v22  ;;  %1425 = vrcp.f32 %v777_v20  ;;  %v796_v26 = vmul.f32 %v1416_v23, %v1668_v19  ;;  %v1006_v19 = vld [vmem:[%s1791_s5] sm:$0xff] }
 0x273   : > { %v795_v25 = vmul.f32 %v1418_v24, %v1670_v21 }
 0x275   : > { %v1420_v27 = vpop.eup %1419  ;;  %1310 = vmatprep.mubr.msk.f32.mxu0 %vm648_vm2, %v795_v25 }
 0x276   : > { %v1422_v28 = vpop.eup %1421  ;;  %1311 = vmatmul.mubr.msk.f32.gmra.mrb[4].mxu0 %vm648_vm2, %v796_v26  ;;  %v798_v12 = vmul.f32 %v1420_v27, %v1676_v29  ;;  %v1007_v29 = vld [vmem:[%s1791_s5 + $0x8] sm:$0xff] }
 0x277   : > { %v797_v10 = vmul.f32 %v1422_v28, %v1678_v32  ;;  %v1345_v32 = vpack.c.bf16 %v1007_v29, %v1006_v19 }
 0x279   : > { %1313 = vmatprep.mubr.msk.f32.mxu0 %vm648_vm2, %v797_v10  ;;  %v1424_v30 = vpop.eup %1423  ;;  %1346 = vmatpush3.bf16.msra.mxu1 %v1345_v32 }
 0x27a   : > { %1314 = vmatmul.mubr.msk.f32.gmra.mrb[6].mxu0 %vm648_vm2, %v798_v12  ;;  %v800_v21 = vmul.f32 %v1424_v30, %v1684_v43  ;;  %1347 = vmatprep.subr.bf16.mxu1 %v1493_v3 }
 0x27c   : > { %v1426_v31 = vpop.eup %1425 }
 0x27d   : > { %v799_v33 = vmul.f32 %v1426_v31, %v1410_v54  ;;  %1349 = vmatpush3.bf16.msra.mxu1 %v1348_v36 }
 0x27f   : > { %1316 = vmatprep.mubr.msk.f32.mxu0 %vm648_vm2, %v799_v33 }
 0x280   : > { %1317 = vmatmul.mubr.msk.f32.gmra.mrb[8].mxu0 %vm648_vm2, %v800_v21 }
 0x345   : > { %v1309_v38 = vpop.f32.mrb[2].mxu0 }
 0x346   : > { %v935_v39 = vmul.f32 %v1309_v38, %v932_v37  ;;  %v892_v40 = vpop.f32.mrb[3].mxu0 }
 0x347   : > { %v934_v41 = vmul.f32 %v932_v37, %v892_v40 }
 0x348   : > { %v949_v42 = vsel %vm340_vm1, %v935_v39, 0.0 }
 0x349   : > { %v950_v43 = vrot.slane %v949_v42, 4  ;;  %v942_v3 = vsel %vm340_vm1, %v934_v41, 0.0  ;;  %v1312_v44 = vpop.f32.mrb[4].mxu0 }
 0x34a   : > { %v943_v45 = vrot.slane %v942_v3, 4  ;;  %v937_v46 = vmul.f32 %v1312_v44, %v932_v37  ;;  %v902_v47 = vpop.f32.mrb[5].mxu0 }
 0x34b   : > { %v951_v48 = vadd.f32 %v950_v43, %v949_v42  ;;  %v936_v49 = vmul.f32 %v932_v37, %v902_v47 }
 0x34c   : > { %v944_v50 = vadd.f32 %v943_v45, %v942_v3  ;;  %v963_v51 = vsel %vm340_vm1, %v937_v46, 0.0 }
 0x34d   : > { %v952_v52 = vrot.slane %v951_v48, 2  ;;  %v964_v53 = vrot.slane %v963_v51, 4  ;;  %v956_v54 = vsel %vm340_vm1, %v936_v49, 0.0  ;;  %v1315_v55 = vpop.f32.mrb[6].mxu0 }
 0x34e   : > { %v945_v56 = vrot.slane %v944_v50, 2  ;;  %v957_v57 = vrot.slane %v956_v54, 4  ;;  %v939_v58 = vmul.f32 %v1315_v55, %v932_v37  ;;  %v912_v59 = vpop.f32.mrb[7].mxu0 }
 0x34f   : > { %v953_v60 = vadd.f32 %v952_v52, %v951_v48  ;;  %v965_v61 = vadd.f32 %v964_v53, %v963_v51  ;;  %v938_v62 = vmul.f32 %v932_v37, %v912_v59  ;;  %v1235_v53 = vld [vmem:[%s1792_s6] ss:$0 sm:$0xff] }
 0x350   : > { %v946_v63 = vadd.f32 %v945_v56, %v944_v50  ;;  %v958_v1 = vadd.f32 %v957_v57, %v956_v54  ;;  %v977_v2 = vsel %vm340_vm1, %v939_v58, 0.0  ;;  %v1005_v54 = vadd.f32 %v1235_v53, %v1619_v8 }
 0x351   : > { %v954_v5 = vrot.slane %v953_v60, 1  ;;  %v966_v0 = vrot.slane %v965_v61, 2  ;;  %v978_v6 = vrot.slane %v977_v2, 4  ;;  %v970_v7 = vsel %vm340_vm1, %v938_v62, 0.0 }
 0x352   : > { %v947_v4 = vrot.slane %v946_v63, 1  ;;  %v959_v9 = vrot.slane %v958_v1, 2  ;;  %v971_v11 = vrot.slane %v970_v7, 4 }
 0x353   : > { %v955_v13 = vadd.f32 %v954_v5, %v953_v60  ;;  %v967_v14 = vadd.f32 %v966_v0, %v965_v61  ;;  %v979_v15 = vadd.f32 %v978_v6, %v977_v2  ;;  %v1318_v16 = vpop.f32.mrb[8].mxu0 }
 0x354   : > { %v948_v17 = vadd.f32 %v947_v4, %v946_v63  ;;  %v960_v18 = vadd.f32 %v959_v9, %v958_v1  ;;  %v972_v20 = vadd.f32 %v971_v11, %v970_v7  ;;  %v941_v22 = vmul.f32 %v1318_v16, %v932_v37  ;;  %v922_v23 = vpop.f32.mrb[9].mxu0  ;;  %v1237_v7 = vld [vmem:[%s1793_s7] ss:$0 sm:$0xff] }
 0x355   : > { %v968_v24 = vrot.slane %v967_v14, 1  ;;  %v980_v25 = vrot.slane %v979_v15, 2  ;;  %v940_v26 = vmul.f32 %v932_v37, %v922_v23  ;;  %v1238_v9 = vld [vmem:[%s1794_s8] ss:$0 sm:$0xff] }
 0x356   : > { %v1019_v27 = vsel %vm1018_vm3, %v955_v13, %v948_v17  ;;  %v961_v28 = vrot.slane %v960_v18, 1  ;;  %v973_v10 = vrot.slane %v972_v20, 2  ;;  %v991_v12 = vsel %vm340_vm1, %v941_v22, 0.0 }
 0x357   : > { %v981_v30 = vadd.f32 %v980_v25, %v979_v15  ;;  %v992_v31 = vrot.slane %v991_v12, 4  ;;  %v984_v33 = vsel %vm340_vm1, %v940_v26, 0.0  ;;  %v969_v32 = vadd.f32 %v968_v24, %v967_v14 }
 0x358   : > { %v962_v21 = vadd.f32 %v961_v28, %v960_v18  ;;  %v974_v19 = vadd.f32 %v973_v10, %v972_v20  ;;  %v985_v29 = vrot.slane %v984_v33, 4 }
 0x359   : > { %v982_v34 = vrot.slane %v981_v30, 1  ;;  %v993_v35 = vadd.f32 %v992_v31, %v991_v12 }
 0x35a   : > { %v1021_v36 = vsel %vm1020_vm4, %v962_v21, %v1019_v27  ;;  %v975_v38 = vrot.slane %v974_v19, 1  ;;  %v986_v37 = vadd.f32 %v985_v29, %v984_v33 }
 0x35b   : > { %v1023_v39 = vsel %vm1022_vm5, %v969_v32, %v1021_v36  ;;  %v994_v40 = vrot.slane %v993_v35, 2  ;;  %v983_v43 = vadd.f32 %v982_v34, %v981_v30 }
 0x35c   : > { %v976_v41 = vadd.f32 %v975_v38, %v974_v19  ;;  %v987_v42 = vrot.slane %v986_v37, 2 }
 0x35d   : > { %v995_v3 = vadd.f32 %v994_v40, %v993_v35 }
 0x35e   : > { %v1025_v44 = vsel %vm1024_vm6, %v976_v41, %v1023_v39  ;;  %v988_v45 = vadd.f32 %v987_v42, %v986_v37 }
 0x35f   : > { %v996_v46 = vrot.slane %v995_v3, 1  ;;  %v1027_v47 = vsel %vm1026_vm7, %v983_v43, %v1025_v44 }
 0x360   : > { %v989_v48 = vrot.slane %v988_v45, 1 }
 0x361   : > { %v997_v50 = vadd.f32 %v996_v46, %v995_v3 }
 0x362   : > { %v990_v49 = vadd.f32 %v989_v48, %v988_v45 }
 0x364   : > { %v1029_v51 = vsel %vm1028_vm8, %v990_v49, %v1027_v47 }
 0x365   : > { %v1031_v52 = vsel %vm1030_vm9, %v997_v50, %v1029_v51 }
 0x366   : > { %1328 = vmatmul.mubr.msk.f32.vlgmr.msra.gmra.mrb[8].mxu1 %vm340_vm1, %v1031_v52 }
 0x439   : > { %v1100_v55 = vpop.f32.mrb[8].mxu1 }
 0x43a   : > { %v1104_v56 = vadd.f32 %v1100_v55, %v1005_v54  ;;  %v1329_v57 = vpop.f32.mrb[9].mxu1 }
 0x43c   : > { %v1105_v58 = vsel %vm340_vm1, %v1104_v56, 0.0  ;;  %v1110_v59 = vmul.f32 %v1104_v56, %v1104_v56 }
 0x43d   : > { %1106 = vadd.xlane.f32.xlu1 %v1105_v58 }
 0x43e   : > { %v1111_v60 = vsel %vm340_vm1, %v1110_v59, 0.0 }
 0x441   : > { %1112 = vadd.xlane.f32.xlu1 %v1111_v60 }
 0x4ca   : > { %v1107_v61 = vpop.xlane.xlu1 %1106 }
 0x4cb   : > { %v1109_v62 = vmul.f32 0.03125, %v1107_v61 }
 0x4cd   : > { %v1115_v1 = vmul.f32 %v1109_v62, %v1109_v62  ;;  %v1117_v8 = vsub.f32 %v1104_v56, %v1109_v62 }
 0x4ce   : > { %v1113_v63 = vpop.xlane.xlu1 %1112 }
 0x4cf   : > { %v1114_v2 = vmul.f32 0.03125, %v1113_v63 }
 0x4d1   : > { %v1116_v5 = vsub.f32 %v1114_v2, %v1115_v1 }
 0x4d3   : > { %v1118_v0 = vadd.f32 1e-05, %v1116_v5 }
 0x4d5   : > { %1427 = vrsqrt.f32 %v1118_v0 }
 0x4df   : > { %v1428_v6 = vpop.eup %1427 }
 0x4e0   : > { %v1120_v4 = vmul.f32 %v1428_v6, %v1117_v8 }
 0x4e2   : > { %v1128_v11 = vmul.f32 %v1237_v7, %v1120_v4 }
 0x4e4   : > { %v1136_v13 = vadd.f32 %v1238_v9, %v1128_v11 }
 0x4e6   : > { %1137 = vst.msk [vmem:[%s323_s29] sm:$0xff] %vm340_vm1, %v1136_v13 }
 0x4e7   : > { %1442 = shalt.err (!%p1439_p3)
}
 0x4e8   : > { %s1443_s22 = scalar_lea.hbm %s1743_s21, 128  ;;  %s1447_s29 = scalar_lea.hbm %s1795_s9, 256 }
 0x4e9   : > { %p1444_p4 = scmp.ne.s32.totalorder %s1743_s21, %s1443_s22  ;;  %p1448_p9 = scmp.lt.u32.totalorder %s1743_s21, %s1795_s9 }
 0x4ea   : > { %p1449_p10 = scmp.lt.u32.totalorder %s1447_s29, %s1443_s22  ;;  %p1451_p12 = scmp.lt.u32.totalorder %s1443_s22, %s1743_s21 }
 0x4eb   : > { %p1445_p7 = pnand %p1444_p4, %p1588_p5 }
 0x4ec   : > { %p1450_p11 = por %p1449_p10, %p1448_p9 }
 0x4ed   : > { %p1446_p8 = pneg %p1445_p7 }
 0x4ee   : > { %p1452_p13 = por %p1451_p12, %p1450_p11 }
 0x4f0   : > { %p1453_p0 = pnand %p1452_p13, %p1446_p8 }
 0x4f2   : > { %1456 = shalt.err (!%p1453_p0)
}
 0x4f3   : > { %1350 = dma.vmem_to_hbm [thread:$0]  (%p1588_p5), %s1745_s14, 128, %s1743_s21, %s1139_s24  }
 0x4f4 PF: > { %p1356_p1 = scmp.ge.s32.totalorder %s1491_s12, 2  ;;  %s1164_s25 = sand.u32 1, %s1479_s30  }
 0x4f5   : > { %s1165_s13 = scalar_lea.sflag [#allocation3], %s1164_s25 }
 0x4f6   : > { %p1353_p2 = pnand %p1356_p1, %p1592_p6 }
 0x4f8   : > { %1474 = dma.done.wait (!%p1353_p2), %s1165_s13, 128  }
 0x4f9   : > { %1476 = vsyncadd (!%p1353_p2), %s1165_s13, 4294967168  ;;  %p19_p3 = scmp.ge.s32.totalorder %s1575_s15, 4   ;;  %s1798_s30 = smov %s1483_s10 }
 0x4fa   : > { %s1799_s10 = smov %s1487_s11  ;;  %s1800_s11 = smov %s1586_s18 }
 0x4fb   : > { %s1801_s12 = smov %s1575_s15  ;;  %21 = sbr.rel (!%p19_p3) target bundleno = 3 (0x3), region = 91 }
 0x502   :  { %1170 = vsyncpa [#allocation3], 1 }
 0x503   :  { %1172 = vsyncpa [#allocation3 + $0x1], 1 }

</bundles_post_ra>
